<compile_context>
chip_gen: v5e
topology: v5e:2x2
jax: 0.10.0
libtpu: 0.0.40
codegen_flags: <defaults>
</compile_context>

<pallas_src>
import jax
import jax.numpy as jnp
from jax.experimental import pallas as pl
from jax.experimental.pallas import tpu as pltpu

HIDDEN = 256


def _round_up(x, m):
    return ((x + m - 1) // m) * m


def _vmem_limit_bytes():
    """Scoped-VMEM limit ~= half of physical VMEM (64 MiB v5e/v6e, 32 MiB v7x)."""
    cap = 64 * 1024 * 1024  # conservative default = v7x-sized per-core VMEM
    try:
        cap = int(getattr(pltpu.get_tpu_info(), "vmem_capacity_bytes", cap))
    except Exception:
        pass
    return max(16 * 1024 * 1024, min(96 * 1024 * 1024, cap // 2))


def _pick_batch_tile(B, vmem_limit_bytes, per_row_bytes, fixed_bytes):
    """Largest MXU-friendly batch tile that fits the VMEM budget.

    Small batches: one tile rounded to 16 rows (bf16 sublane packing).
    Large batches: sweep 256..4096 (multiples of 256 = MXU M dimension),
    capped so at least two grid blocks exist (megacore sharding on v7x).
    """
    if B <= 512:
        return max(16, _round_up(B, 16))
    budget = int(0.6 * vmem_limit_bytes) - fixed_bytes
    tb = 256
    for cand in (512, 1024, 2048, 4096):
        if cand * per_row_bytes <= budget:
            tb = cand
    half = max(256, _round_up((B + 1) // 2, 256))   # keep >= 2 grid blocks
    return min(tb, half)


def value_net_kernel(s_ref, a_ref, w1s_ref, w1a_ref, b1_ref,
                     w2_ref, b2_ref, w3_ref, b3_ref, out_ref):
    # fc1 as split-K over (state | action): two MXU dots, bf16 operands,
    # f32 accumulation.  bf16 casts happen on-chip so the streamed operands
    # are read from HBM once, in their original f32 layout.
    s = s_ref[...].astype(jnp.bfloat16)
    a = a_ref[...].astype(jnp.bfloat16)
    h1 = jnp.dot(s, w1s_ref[...], preferred_element_type=jnp.float32)
    h1 = h1 + jnp.dot(a, w1a_ref[...], preferred_element_type=jnp.float32)
    h1 = jnp.maximum(h1 + b1_ref[...], 0.0)

    # fc2: relu(h1 @ W2 + b2)
    h2 = jnp.dot(h1.astype(jnp.bfloat16), w2_ref[...],
                 preferred_element_type=jnp.float32) + b2_ref[...]
    h2 = jnp.maximum(h2, 0.0)

    # fc3 (256 -> 1): VPU multiply + lane reduction (avoids an N=1 MXU pass).
    # b3 is a scalar read from SMEM.
    out_ref[...] = (jnp.sum(h2 * w3_ref[...], axis=-1, keepdims=True)
                    + b3_ref[0, 0])


def value_net_forward(state, action, params):
    """Full critic MLP: concat -> fc1(relu) -> fc2(relu) -> fc3."""
    w1, b1, w2, b2, w3, b3 = params
    B, obs_dim = state.shape
    act_dim = action.shape[1]
    in_dim = obs_dim + act_dim

    vmem_limit = _vmem_limit_bytes()

    # VMEM budget per batch row (bytes): double-buffered streamed f32 blocks,
    # the lane-padded (TB, 1) output block, and the in-kernel f32/bf16
    # temporaries (h1/h2 dominate, ~TB x 256 x 4 B each).
    per_row = (2 * 4 * in_dim        # state + action blocks, x2 buffers
               + 2 * 4 * 128         # (TB, 1) out block padded to 128 lanes
               + 2 * in_dim          # in-kernel bf16 cast of the inputs
               + 4 * HIDDEN * 4)     # h1/h2 f32 + h1 bf16 + fc3 temporaries
    fixed = (2 * 2 * (in_dim * HIDDEN + HIDDEN * HIDDEN + HIDDEN)  # bf16 W, x2
             + 8 * 1024)                                           # f32 biases

    TB = _pick_batch_tile(B, vmem_limit, per_row, fixed)
    Bp = _round_up(B, TB)

    state = state.astype(jnp.float32)
    action = action.astype(jnp.float32)
    if Bp != B:
        # Only materialises a padded copy for ragged batches; common
        # power-of-two batch sizes stream straight from the caller's buffers.
        state = jnp.pad(state, ((0, Bp - B), (0, 0)))
        action = jnp.pad(action, ((0, Bp - B), (0, 0)))

    # One-time weight casts / splits (stay VMEM-resident across grid steps).
    w1b = w1.astype(jnp.bfloat16)
    w1s = w1b[:obs_dim]                              # (obs_dim, 256)
    w1a = w1b[obs_dim:]                              # (act_dim, 256)
    w2b = w2.astype(jnp.bfloat16)                    # (256, 256)
    w3r = w3.reshape(1, HIDDEN).astype(jnp.float32)  # (1, 256) row for VPU
    b1f = b1.reshape(1, HIDDEN).astype(jnp.float32)
    b2f = b2.reshape(1, HIDDEN).astype(jnp.float32)
    b3f = b3.reshape(1, 1).astype(jnp.float32)

    num_blocks = Bp // TB

    flops = 2 * Bp * (in_dim * HIDDEN + HIDDEN * HIDDEN + HIDDEN)
    bytes_accessed = (Bp * in_dim * 4                 # state/action, read once
                      + (w1s.size + w1a.size + w2b.size) * 2
                      + (b1f.size + b2f.size + w3r.size + b3f.size) * 4
                      + Bp * 4)                       # output

    def resident(arr):
        # Whole-array block, constant block index -> DMA'd once, stays in VMEM.
        return pl.BlockSpec(arr.shape, lambda i: (0,) * arr.ndim)

    out = pl.pallas_call(
        value_net_kernel,
        out_shape=jax.ShapeDtypeStruct((Bp, 1), jnp.float32),
        grid_spec=pltpu.PrefetchScalarGridSpec(
            num_scalar_prefetch=0,
            grid=(num_blocks,),
            in_specs=[
                pl.BlockSpec((TB, obs_dim), lambda i: (i, 0)),  # streamed state
                pl.BlockSpec((TB, act_dim), lambda i: (i, 0)),  # streamed action
                resident(w1s), resident(w1a), resident(b1f),
                resident(w2b), resident(b2f),
                resident(w3r),
                pl.BlockSpec(memory_space=pltpu.MemorySpace.SMEM),  # b3 scalar
            ],
            out_specs=pl.BlockSpec((TB, 1), lambda i: (i, 0)),
        ),
        compiler_params=pltpu.CompilerParams(
            dimension_semantics=("parallel",),
            vmem_limit_bytes=int(vmem_limit),
        ),
        cost_estimate=pl.CostEstimate(
            flops=int(flops), transcendentals=0,
            bytes_accessed=int(bytes_accessed)),
    )(state, action, w1s, w1a, b1f, w2b, b2f, w3r, b3f)

    return out[:B]


def init_params(key, observation_dim, action_dim):
    """Deterministic synthetic init (shapes match the nn.Linear layers)."""
    ks = jax.random.split(key, 6)
    in_dim = observation_dim + action_dim
    w1 = jax.random.normal(ks[0], (in_dim, HIDDEN), jnp.float32) * 0.05
    b1 = jax.random.normal(ks[1], (1, HIDDEN), jnp.float32) * 0.05
    w2 = jax.random.normal(ks[2], (HIDDEN, HIDDEN), jnp.float32) * 0.05
    b2 = jax.random.normal(ks[3], (1, HIDDEN), jnp.float32) * 0.05
    w3 = jax.random.normal(ks[4], (HIDDEN, 1), jnp.float32) * 0.05
    b3 = jax.random.normal(ks[5], (1, 1), jnp.float32) * 0.05
    return (w1, b1, w2, b2, w3, b3)


def reference_forward(state, action, params):
    """Pure-JAX f32 reference identical to the PyTorch forward."""
    w1, b1, w2, b2, w3, b3 = params
    x = jnp.concatenate([state, action], axis=1)
    x = jax.nn.relu(x @ w1 + b1)
    x = jax.nn.relu(x @ w2 + b2)
    return x @ w3 + b3


if __name__ == "__main__":
    OBS_DIM, ACT_DIM = 16, 8
    key = jax.random.PRNGKey(0)
    k_s, k_a, k_p, k_s2, k_a2 = jax.random.split(key, 5)
    params = init_params(k_p, OBS_DIM, ACT_DIM)

    # Small batch (single padded tile).
    B = 8
    state = jax.random.normal(k_s, (B, OBS_DIM), jnp.float32)
    action = jax.random.normal(k_a, (B, ACT_DIM), jnp.float32)
    out = jax.block_until_ready(value_net_forward(state, action, params))
    ref = reference_forward(state, action, params)
    assert out.shape == (B, 1), out.shape
    # bf16 matmul operands with f32 accumulation -> loosened tolerance vs f32.
    assert jnp.allclose(out, ref, atol=2e-2, rtol=2e-2), (out, ref)

    # Larger ragged batch (multi-block grid path, exercises padding + tiling).
    B2 = 600
    state2 = jax.random.normal(k_s2, (B2, OBS_DIM), jnp.float32)
    action2 = jax.random.normal(k_a2, (B2, ACT_DIM), jnp.float32)
    out2 = jax.block_until_ready(value_net_forward(state2, action2, params))
    ref2 = reference_forward(state2, action2, params)
    assert out2.shape == (B2, 1), out2.shape
    assert jnp.allclose(out2, ref2, atol=2e-2, rtol=2e-2)

    print("KERNEL_OK")
</pallas_src>

<mosaic_0001>
module attributes {stable_mosaic.version = 11 : i64} {
  func.func @value_net_kernel(%arg0: i32, %arg1: memref<16x16xf32, #tpu.memory_space<vmem>>, %arg2: memref<16x8xf32, #tpu.memory_space<vmem>>, %arg3: memref<16x256xbf16, #tpu.memory_space<vmem>>, %arg4: memref<8x256xbf16, #tpu.memory_space<vmem>>, %arg5: memref<1x256xf32, #tpu.memory_space<vmem>>, %arg6: memref<256x256xbf16, #tpu.memory_space<vmem>>, %arg7: memref<1x256xf32, #tpu.memory_space<vmem>>, %arg8: memref<1x256xf32, #tpu.memory_space<vmem>>, %arg9: memref<1x1xf32, #tpu.memory_space<smem>>, %arg10: memref<16x1xf32, #tpu.memory_space<vmem>>) attributes {dimension_semantics = [#tpu.dimension_semantics<parallel>], iteration_bounds = array<i64: 1>, scalar_prefetch = 0 : i64, scratch_operands = 0 : i64, tpu.core_type = #tpu.core_type<tc>, window_params = [{transform_indices = @transform_0, window_bounds = array<i64: 16, 16>}, {transform_indices = @transform_1, window_bounds = array<i64: 16, 8>}, {pipeline_mode = #tpu.pipeline_mode<synchronous>, transform_indices = @transform_2, window_bounds = array<i64: 16, 256>}, {pipeline_mode = #tpu.pipeline_mode<synchronous>, transform_indices = @transform_3, window_bounds = array<i64: 8, 256>}, {pipeline_mode = #tpu.pipeline_mode<synchronous>, transform_indices = @transform_4, window_bounds = array<i64: 1, 256>}, {pipeline_mode = #tpu.pipeline_mode<synchronous>, transform_indices = @transform_5, window_bounds = array<i64: 256, 256>}, {pipeline_mode = #tpu.pipeline_mode<synchronous>, transform_indices = @transform_6, window_bounds = array<i64: 1, 256>}, {pipeline_mode = #tpu.pipeline_mode<synchronous>, transform_indices = @transform_7, window_bounds = array<i64: 1, 256>}, {transform_indices = @transform_8, window_bounds = array<i64: 1, 1>}, {transform_indices = @transform_9, window_bounds = array<i64: 16, 1>}]} {
    %c0 = arith.constant 0 : index
    %c0_0 = arith.constant 0 : index
    %0 = vector.load %arg1[%c0, %c0_0] : memref<16x16xf32, #tpu.memory_space<vmem>>, vector<16x16xf32>
    %1 = arith.truncf %0 : vector<16x16xf32> to vector<16x16xbf16>
    %c0_1 = arith.constant 0 : index
    %c0_2 = arith.constant 0 : index
    %2 = vector.load %arg2[%c0_1, %c0_2] : memref<16x8xf32, #tpu.memory_space<vmem>>, vector<16x8xf32>
    %3 = arith.truncf %2 : vector<16x8xf32> to vector<16x8xbf16>
    %c0_3 = arith.constant 0 : index
    %c0_4 = arith.constant 0 : index
    %4 = vector.load %arg3[%c0_3, %c0_4] : memref<16x256xbf16, #tpu.memory_space<vmem>>, vector<16x256xbf16>
    %cst = arith.constant dense<0.000000e+00> : vector<16x256xf32>
    %5 = tpu.matmul %1, %4, %cst {dimension_numbers = #tpu.dot_dimension_numbers<[1], [0], [0], [1], [0, 0, 1, 1], [], []>} : vector<16x16xbf16>, vector<16x256xbf16>, vector<16x256xf32> -> vector<16x256xf32>
    %c0_5 = arith.constant 0 : index
    %c0_6 = arith.constant 0 : index
    %6 = vector.load %arg4[%c0_5, %c0_6] : memref<8x256xbf16, #tpu.memory_space<vmem>>, vector<8x256xbf16>
    %cst_7 = arith.constant dense<0.000000e+00> : vector<16x256xf32>
    %7 = tpu.matmul %3, %6, %cst_7 {dimension_numbers = #tpu.dot_dimension_numbers<[1], [0], [0], [1], [0, 0, 1, 1], [], []>} : vector<16x8xbf16>, vector<8x256xbf16>, vector<16x256xf32> -> vector<16x256xf32>
    %8 = arith.addf %5, %7 : vector<16x256xf32>
    %c0_8 = arith.constant 0 : index
    %c0_9 = arith.constant 0 : index
    %9 = vector.load %arg5[%c0_8, %c0_9] : memref<1x256xf32, #tpu.memory_space<vmem>>, vector<1x256xf32>
    %10 = vector.broadcast %9 : vector<1x256xf32> to vector<16x256xf32>
    %11 = arith.addf %8, %10 : vector<16x256xf32>
    %cst_10 = arith.constant 0.000000e+00 : f32
    %12 = vector.broadcast %cst_10 : f32 to vector<16x256xf32>
    %13 = arith.maximumf %11, %12 : vector<16x256xf32>
    %14 = arith.truncf %13 : vector<16x256xf32> to vector<16x256xbf16>
    %c0_11 = arith.constant 0 : index
    %c0_12 = arith.constant 0 : index
    %15 = vector.load %arg6[%c0_11, %c0_12] : memref<256x256xbf16, #tpu.memory_space<vmem>>, vector<256x256xbf16>
    %cst_13 = arith.constant dense<0.000000e+00> : vector<16x256xf32>
    %16 = tpu.matmul %14, %15, %cst_13 {dimension_numbers = #tpu.dot_dimension_numbers<[1], [0], [0], [1], [0, 0, 1, 1], [], []>} : vector<16x256xbf16>, vector<256x256xbf16>, vector<16x256xf32> -> vector<16x256xf32>
    %c0_14 = arith.constant 0 : index
    %c0_15 = arith.constant 0 : index
    %17 = vector.load %arg7[%c0_14, %c0_15] : memref<1x256xf32, #tpu.memory_space<vmem>>, vector<1x256xf32>
    %18 = vector.broadcast %17 : vector<1x256xf32> to vector<16x256xf32>
    %19 = arith.addf %16, %18 : vector<16x256xf32>
    %cst_16 = arith.constant 0.000000e+00 : f32
    %20 = vector.broadcast %cst_16 : f32 to vector<16x256xf32>
    %21 = arith.maximumf %19, %20 : vector<16x256xf32>
    %c0_17 = arith.constant 0 : index
    %c0_18 = arith.constant 0 : index
    %22 = vector.load %arg8[%c0_17, %c0_18] : memref<1x256xf32, #tpu.memory_space<vmem>>, vector<1x256xf32>
    %23 = vector.broadcast %22 : vector<1x256xf32> to vector<16x256xf32>
    %24 = arith.mulf %21, %23 : vector<16x256xf32>
    %cst_19 = arith.constant dense<0.000000e+00> : vector<16xf32>
    %25 = vector.multi_reduction <add>, %24, %cst_19 [1] : vector<16x256xf32> to vector<16xf32>
    %26 = vector.shape_cast %25 : vector<16xf32> to vector<16x1xf32>
    %c0_20 = arith.constant 0 : index
    %c0_21 = arith.constant 0 : index
    %27 = memref.load %arg9[%c0_20, %c0_21] : memref<1x1xf32, #tpu.memory_space<smem>>
    %28 = vector.broadcast %27 : f32 to vector<16x1xf32>
    %29 = arith.addf %26, %28 : vector<16x1xf32>
    %c0_22 = arith.constant 0 : index
    %c0_23 = arith.constant 0 : index
    %30 = vector.load %arg10[%c0_22, %c0_23] : memref<16x1xf32, #tpu.memory_space<vmem>>, vector<16x1xf32>
    tpu.vector_store %arg10[%c0_22, %c0_23], %29 {strides = array<i32>} : memref<16x1xf32, #tpu.memory_space<vmem>>, vector<16x1xf32>,
    return
  }
  func.func @transform_0(%arg0: i32) -> (i32, i32) {
    %c0_i32 = arith.constant 0 : i32
    %c0_i32_0 = arith.constant 0 : i32
    return %arg0, %c0_i32 : i32, i32
  }
  func.func @transform_1(%arg0: i32) -> (i32, i32) {
    %c0_i32 = arith.constant 0 : i32
    %c0_i32_0 = arith.constant 0 : i32
    return %arg0, %c0_i32 : i32, i32
  }
  func.func @transform_2(%arg0: i32) -> (i32, i32) {
    %c0_i32 = arith.constant 0 : i32
    %c0_i32_0 = arith.constant 0 : i32
    %c0_i32_1 = arith.constant 0 : i32
    return %c0_i32, %c0_i32_0 : i32, i32
  }
  func.func @transform_3(%arg0: i32) -> (i32, i32) {
    %c0_i32 = arith.constant 0 : i32
    %c0_i32_0 = arith.constant 0 : i32
    %c0_i32_1 = arith.constant 0 : i32
    return %c0_i32, %c0_i32_0 : i32, i32
  }
  func.func @transform_4(%arg0: i32) -> (i32, i32) {
    %c0_i32 = arith.constant 0 : i32
    %c0_i32_0 = arith.constant 0 : i32
    %c0_i32_1 = arith.constant 0 : i32
    return %c0_i32, %c0_i32_0 : i32, i32
  }
  func.func @transform_5(%arg0: i32) -> (i32, i32) {
    %c0_i32 = arith.constant 0 : i32
    %c0_i32_0 = arith.constant 0 : i32
    %c0_i32_1 = arith.constant 0 : i32
    return %c0_i32, %c0_i32_0 : i32, i32
  }
  func.func @transform_6(%arg0: i32) -> (i32, i32) {
    %c0_i32 = arith.constant 0 : i32
    %c0_i32_0 = arith.constant 0 : i32
    %c0_i32_1 = arith.constant 0 : i32
    return %c0_i32, %c0_i32_0 : i32, i32
  }
  func.func @transform_7(%arg0: i32) -> (i32, i32) {
    %c0_i32 = arith.constant 0 : i32
    %c0_i32_0 = arith.constant 0 : i32
    %c0_i32_1 = arith.constant 0 : i32
    return %c0_i32, %c0_i32_0 : i32, i32
  }
  func.func @transform_8(%arg0: i32) -> (i32, i32) {
    %c0_i32 = arith.constant 0 : i32
    %c0_i32_0 = arith.constant 0 : i32
    %c0_i32_1 = arith.constant 0 : i32
    return %c0_i32, %c0_i32_0 : i32, i32
  }
  func.func @transform_9(%arg0: i32) -> (i32, i32) {
    %c0_i32 = arith.constant 0 : i32
    %c0_i32_0 = arith.constant 0 : i32
    return %arg0, %c0_i32 : i32, i32
  }
}

</mosaic_0001>

<bundles_post_ra>
// kernel: tpu_custom_call.1
= control target key start
LH: loop header
LB: loop body
LE: loop exit
PB: predicated region body
PF: predicated region fallthrough
CT: control target
= control target key end

     0   :  { %15 = vsyncpa [#allocation4], 0  ;;  %s793_s0 = inlined_call_operand.vmem [shape: f32[16,16], index: 0, kind: input, shape index: {}]   ;;  %s794_s1 = inlined_call_operand.vmem [shape: f32[16,8], index: 1, kind: input, shape index: {}]   ;;  %s795_s2 = inlined_call_operand.hbm [shape: bf16[16,256], index: 2, kind: input, shape index: {}]   ;;  %s796_s3 = inlined_call_operand.vmem [shape: bf16[8,256], index: 3, kind: input, shape index: {}]   ;;  %s797_s4 = inlined_call_operand.vmem [shape: f32[1,256], index: 4, kind: input, shape index: {}]   ;;  %s798_s5 = inlined_call_operand.hbm [shape: bf16[256,256], index: 5, kind: input, shape index: {}]   ;;  %s799_s6 = inlined_call_operand.vmem [shape: f32[1,256], index: 6, kind: input, shape index: {}]   ;;  %s800_s7 = inlined_call_operand.vmem [shape: f32[1,256], index: 7, kind: input, shape index: {}]   ;;  %s801_s8 = inlined_call_operand.<no memory space> [shape: f32[1,1], index: 8, kind: input, shape index: {}]   ;;  %s802_s9 = inlined_call_operand.vmem [shape: f32[16,1], index: 9, kind: output, shape index: {}]  }
   0x1   :  { %s25_s11 = sshll.u32 %s795_s2, 4  ;;  %s26_s11 = int_to_ptr.hbm [resolvable:$true] %s25_s11 }
   0x2   :  { %16 = vsyncpa [#allocation6], 0  ;;  %s694_s12 = smov [#allocation3]   ;;  %s42_s16 = sshll.u32 %s798_s5, 4  ;;  %s43_s16 = int_to_ptr.hbm [resolvable:$true] %s42_s16 }
   0x3   :  { %s27_s13 = sshll.u32 %s694_s12, 4  ;;  %s695_s17 = smov 128   ;;  %s28_s13 = int_to_ptr.vmem [resolvable:$true] %s27_s13 }
   0x4   :  { %s696_s18 = smov 8   ;;  %s697_s19 = smov [#allocation5]  }
   0x5   :  { %33 = dma.hbm_to_vmem [thread:$0]  %s26_s11, 256, %s28_s13, [#allocation4], %s695_s17, %s695_s17, %s696_s18  }
   0x6   :  { %s44_s20 = sshll.u32 %s697_s19, 4  ;;  %s45_s20 = int_to_ptr.vmem [resolvable:$true] %s44_s20 }
   0x7   :  { %50 = dma.hbm_to_vmem [thread:$0]  %s43_s16, 4096, %s45_s20, [#allocation6], %s695_s17, %s695_s17, %s696_s18  }
   0x8   :  { %690 = dma.done.wait [#allocation4], 256  }
   0x9   :  { %691 = vsyncadd [#allocation4], 4294967040 }
   0xa   :  { %692 = dma.done.wait [#allocation6], 4096  }
   0xb   :  { %693 = vsyncadd [#allocation6], 4294963200  ;;  %v468_v0 = vld [vmem:[#allocation3] sm:$0xf]  ;;  %v605_v1 = vld [vmem:[#allocation3 + $0x4] sm:$0xf0] }
   0xc   :  { %v604_v2 = vld [vmem:[#allocation3 + $0x4] sm:$0xf]  ;;  %v469_v3 = vor.u32 %v605_v1, %v468_v0  ;;  %v470_v4 = vld [vmem:[#allocation3 + $0x8] sm:$0xf0]  ;;  %vm84_vm0 = vcmask 1043456   ;;  %vm129_vm1 = vcmask 130048  }
   0xd   :  { %v74_v5 = vld [vmem:[%s796_s3] sm:$0xff]  ;;  %v473_v7 = vor.u32 %v604_v2, %v470_v4  ;;  %v67_v10 = vld [vmem:[%s793_s0 + $0x8] sm:$0xff]  ;;  %vm80_vm2 = vcmask 64512   ;;  %v526_v27 = vld [vmem:[#allocation5 + $0x60] sm:$0xf]  ;;  %vm455_vm3 = vcmask 7168  }
   0xe   :  { %v66_v6 = vld [vmem:[%s793_s0] sm:$0xff]  ;;  %v76_v8 = vunpack.c.l.b16 %v74_v5  ;;  %v77_v9 = vunpack.c.h.b16 %v74_v5  ;;  %v70_v12 = vld [vmem:[%s794_s1 + $0x8] sm:$0xff]  ;;  %140 = vmatpush.bf16.msra.mxu2 %v469_v3  ;;  %v619_v31 = vld [vmem:[#allocation5 + $0x64] sm:$0xf0] }
   0xf   :  { %v69_v11 = vld [vmem:[%s794_s1] sm:$0xff]  ;;  %v68_v13 = vpack.c.bf16 %v67_v10, %v66_v6  ;;  %v621_v15 = vld [vmem:[#allocation5 + $0x74] sm:$0xf0]  ;;  %154 = vmatpush.bf16.msra.mxu3 %v473_v7  ;;  %v536_v22 = vld [vmem:[#allocation5 + $0x78] sm:$0xf0]  ;;  %v527_v37 = vor.u32 %v619_v31, %v526_v27 }
  0x10   :  { %v534_v14 = vld [vmem:[#allocation5 + $0x70] sm:$0xf]  ;;  %v78_v17 = vpack.c.b16 %v76_v8, %v76_v8  ;;  %v79_v18 = vpack.c.b16 %v77_v9, %v77_v9  ;;  %v637_v20 = vld [vmem:[#allocation5 + $0xf4] sm:$0xf0]  ;;  %v620_v21 = vld [vmem:[#allocation5 + $0x74] sm:$0xf]  ;;  %v71_v30 = vpack.c.bf16 %v70_v12, %v69_v11 }
  0x11   :  { %v598_v16 = vld [vmem:[#allocation5 + $0xf0] sm:$0xf]  ;;  %v535_v19 = vor.u32 %v621_v15, %v534_v14  ;;  %v539_v24 = vor.u32 %v620_v21, %v536_v22  ;;  %v636_v25 = vld [vmem:[#allocation5 + $0xf4] sm:$0xf]  ;;  %v600_v26 = vld [vmem:[#allocation5 + $0xf8] sm:$0xf0]  ;;  %474 = vmatmul.msk.bf16.vlgmr.msra.gmra.mxu2 %vm129_vm1, %v68_v13 }
  0x12   :  { %v599_v23 = vor.u32 %v637_v20, %v598_v16  ;;  %v86_v28 = vsel %vm84_vm0, %v78_v17, 0  ;;  %v89_v29 = vsel %vm84_vm0, %v79_v18, 0  ;;  %v590_v32 = vld [vmem:[#allocation5 + $0xe0] sm:$0xf]  ;;  %v603_v33 = vor.u32 %v636_v25, %v600_v26  ;;  %v635_v34 = vld [vmem:[#allocation5 + $0xe4] sm:$0xf0]  ;;  %475 = vmatmul.msk.bf16.vlgmr.msra.gmra.mxu3 %vm129_vm1, %v68_v13 }
  0x13   :  { %98 = vmatpush.bf16.msra.mxu0 %v86_v28  ;;  %112 = vmatpush.bf16.msra.mxu1 %v89_v29  ;;  %v618_v35 = vld [vmem:[#allocation5 + $0x64] sm:$0xf]  ;;  %v528_v36 = vld [vmem:[#allocation5 + $0x68] sm:$0xf0]  ;;  %v591_v40 = vor.u32 %v635_v34, %v590_v32  ;;  %v518_v42 = vld [vmem:[#allocation5 + $0x50] sm:$0xf] }
  0x14   :  { %v634_v38 = vld [vmem:[#allocation5 + $0xe4] sm:$0xf]  ;;  %v592_v39 = vld [vmem:[#allocation5 + $0xe8] sm:$0xf0]  ;;  %403 = vmatpush.bf16.msrb.mxu2 %v539_v24  ;;  %v531_v41 = vor.u32 %v618_v35, %v528_v36  ;;  %v617_v43 = vld [vmem:[#allocation5 + $0x54] sm:$0xf0]  ;;  %417 = vmatpush.bf16.msrb.mxu3 %v603_v33 }
  0x15   :  { %v582_v44 = vld [vmem:[#allocation5 + $0xd0] sm:$0xf]  ;;  %v633_v45 = vld [vmem:[#allocation5 + $0xd4] sm:$0xf0]  ;;  %v616_v46 = vld [vmem:[#allocation5 + $0x54] sm:$0xf]  ;;  %v595_v48 = vor.u32 %v634_v38, %v592_v39  ;;  %v519_v49 = vor.u32 %v617_v43, %v518_v42 }
  0x16   :  { %464 = vmatmul.msk.bf16.vlgmr.msra.gmra.mxu0 %vm80_vm2, %v71_v30  ;;  %465 = vmatmul.msk.bf16.vlgmr.msra.gmra.mxu1 %vm80_vm2, %v71_v30  ;;  %v520_v47 = vld [vmem:[#allocation5 + $0x58] sm:$0xf0]  ;;  %v632_v50 = vld [vmem:[#allocation5 + $0xd4] sm:$0xf]  ;;  %v583_v52 = vor.u32 %v633_v45, %v582_v44  ;;  %v510_v55 = vld [vmem:[#allocation5 + $0x40] sm:$0xf] }
  0x17   :  { %375 = vmatpush.bf16.msrb.mxu0 %v535_v19  ;;  %389 = vmatpush.bf16.msrb.mxu1 %v599_v23  ;;  %v584_v51 = vld [vmem:[#allocation5 + $0xd8] sm:$0xf0]  ;;  %v523_v53 = vor.u32 %v616_v46, %v520_v47  ;;  %v615_v56 = vld [vmem:[#allocation5 + $0x44] sm:$0xf0]  ;;  %v574_v57 = vld [vmem:[#allocation5 + $0xc0] sm:$0xf] }
  0x18   :  { %404 = vmatpush.bf16.msrb.mxu2 %v531_v41  ;;  %418 = vmatpush.bf16.msrb.mxu3 %v595_v48  ;;  %v587_v54 = vor.u32 %v632_v50, %v584_v51  ;;  %v511_v58 = vor.u32 %v615_v56, %v510_v55  ;;  %v631_v59 = vld [vmem:[#allocation5 + $0xc4] sm:$0xf0]  ;;  %v614_v60 = vld [vmem:[#allocation5 + $0x44] sm:$0xf]  ;;  %v512_v61 = vld [vmem:[#allocation5 + $0x48] sm:$0xf0] }
  0x19   :  { %v575_v62 = vor.u32 %v631_v59, %v574_v57  ;;  %v515_v63 = vor.u32 %v614_v60, %v512_v61  ;;  %v630_v0 = vld [vmem:[#allocation5 + $0xc4] sm:$0xf]  ;;  %v576_v1 = vld [vmem:[#allocation5 + $0xc8] sm:$0xf0]  ;;  %v502_v3 = vld [vmem:[#allocation5 + $0x30] sm:$0xf] }
  0x1a   :  { %v579_v2 = vor.u32 %v630_v0, %v576_v1  ;;  %v613_v4 = vld [vmem:[#allocation5 + $0x34] sm:$0xf0]  ;;  %v566_v6 = vld [vmem:[#allocation5 + $0xb0] sm:$0xf]  ;;  %v612_v9 = vld [vmem:[#allocation5 + $0x34] sm:$0xf] }
  0x1b   :  { %376 = vmatpush.bf16.msrb.mxu0 %v527_v37  ;;  %390 = vmatpush.bf16.msrb.mxu1 %v591_v40  ;;  %v503_v5 = vor.u32 %v613_v4, %v502_v3  ;;  %v629_v7 = vld [vmem:[#allocation5 + $0xb4] sm:$0xf0]  ;;  %v504_v10 = vld [vmem:[#allocation5 + $0x38] sm:$0xf0]  ;;  %v628_v11 = vld [vmem:[#allocation5 + $0xb4] sm:$0xf] }
  0x1c   :  { %405 = vmatpush.bf16.msrb.mxu2 %v523_v53  ;;  %419 = vmatpush.bf16.msrb.mxu3 %v587_v54  ;;  %v567_v8 = vor.u32 %v629_v7, %v566_v6  ;;  %v507_v12 = vor.u32 %v612_v9, %v504_v10  ;;  %v568_v13 = vld [vmem:[#allocation5 + $0xb8] sm:$0xf0]  ;;  %v494_v15 = vld [vmem:[#allocation5 + $0x20] sm:$0xf]  ;;  %v611_v16 = vld [vmem:[#allocation5 + $0x24] sm:$0xf0] }
  0x1d   :  { %v571_v14 = vor.u32 %v628_v11, %v568_v13  ;;  %v495_v17 = vor.u32 %v611_v16, %v494_v15  ;;  %v558_v18 = vld [vmem:[#allocation5 + $0xa0] sm:$0xf]  ;;  %v627_v19 = vld [vmem:[#allocation5 + $0xa4] sm:$0xf0]  ;;  %v610_v20 = vld [vmem:[#allocation5 + $0x24] sm:$0xf] }
  0x1e   :  { %v559_v21 = vor.u32 %v627_v19, %v558_v18  ;;  %v496_v22 = vld [vmem:[#allocation5 + $0x28] sm:$0xf0]  ;;  %v626_v23 = vld [vmem:[#allocation5 + $0xa4] sm:$0xf]  ;;  %v486_v27 = vld [vmem:[#allocation5 + $0x10] sm:$0xf] }
  0x1f   :  { %377 = vmatpush.bf16.msrb.mxu0 %v519_v49  ;;  %391 = vmatpush.bf16.msrb.mxu1 %v583_v52  ;;  %v560_v24 = vld [vmem:[#allocation5 + $0xa8] sm:$0xf0]  ;;  %v499_v25 = vor.u32 %v610_v20, %v496_v22  ;;  %v609_v28 = vld [vmem:[#allocation5 + $0x14] sm:$0xf0]  ;;  %v550_v29 = vld [vmem:[#allocation5 + $0x90] sm:$0xf] }
  0x20   :  { %406 = vmatpush.bf16.msrb.mxu2 %v515_v63  ;;  %420 = vmatpush.bf16.msrb.mxu3 %v579_v2  ;;  %v563_v26 = vor.u32 %v626_v23, %v560_v24  ;;  %v487_v30 = vor.u32 %v609_v28, %v486_v27  ;;  %v625_v31 = vld [vmem:[#allocation5 + $0x94] sm:$0xf0]  ;;  %v608_v32 = vld [vmem:[#allocation5 + $0x14] sm:$0xf]  ;;  %v488_v33 = vld [vmem:[#allocation5 + $0x18] sm:$0xf0] }
  0x21   :  { %v551_v34 = vor.u32 %v625_v31, %v550_v29  ;;  %v491_v35 = vor.u32 %v608_v32, %v488_v33  ;;  %v624_v36 = vld [vmem:[#allocation5 + $0x94] sm:$0xf]  ;;  %v552_v37 = vld [vmem:[#allocation5 + $0x98] sm:$0xf0]  ;;  %v478_v39 = vld [vmem:[#allocation5] sm:$0xf] }
  0x22   :  { %v555_v38 = vor.u32 %v624_v36, %v552_v37  ;;  %v607_v40 = vld [vmem:[#allocation5 + $0x4] sm:$0xf0]  ;;  %v542_v41 = vld [vmem:[#allocation5 + $0x80] sm:$0xf]  ;;  %v606_v44 = vld [vmem:[#allocation5 + $0x4] sm:$0xf] }
  0x23   :  { %378 = vmatpush.bf16.msrb.mxu0 %v511_v58  ;;  %392 = vmatpush.bf16.msrb.mxu1 %v575_v62  ;;  %v479_v42 = vor.u32 %v607_v40, %v478_v39  ;;  %v623_v43 = vld [vmem:[#allocation5 + $0x84] sm:$0xf0]  ;;  %v480_v45 = vld [vmem:[#allocation5 + $0x8] sm:$0xf0]  ;;  %v622_v48 = vld [vmem:[#allocation5 + $0x84] sm:$0xf] }
  0x24   :  { %407 = vmatpush.bf16.msrb.mxu2 %v507_v12  ;;  %421 = vmatpush.bf16.msrb.mxu3 %v571_v14  ;;  %v543_v46 = vor.u32 %v623_v43, %v542_v41  ;;  %v483_v47 = vor.u32 %v606_v44, %v480_v45  ;;  %v544_v49 = vld [vmem:[#allocation5 + $0x88] sm:$0xf0]  ;;  %v161_v54 = vld [vmem:[%s797_s4] sm:$0x3]  ;;  %v452_v44 = vstv %s801_s8 }
  0x25   :  { %v547_v50 = vor.u32 %v622_v48, %v544_v49  ;;  %v163_v57 = vperm.slane %v161_v54, 0  ;;  %v164_v59 = vperm.slane %v161_v54, 1  ;;  %v209_v12 = vld [vmem:[%s799_s6] sm:$0x3] }
  0x26   :  { %v211_v13 = vperm.slane %v209_v12, 0  ;;  %v435_v19 = vld [vmem:[%s800_s7] sm:$0x3] }
  0x27   :  { %379 = vmatpush.bf16.msrb.mxu0 %v503_v5  ;;  %393 = vmatpush.bf16.msrb.mxu1 %v567_v8  ;;  %v437_v24 = vperm.slane %v435_v19, 0  ;;  %v438_v28 = vperm.slane %v435_v19, 1 }
  0x28   :  { %408 = vmatpush.bf16.msrb.mxu2 %v499_v25  ;;  %422 = vmatpush.bf16.msrb.mxu3 %v563_v26 }
  0x2b   :  { %380 = vmatpush.bf16.msrb.mxu0 %v495_v17  ;;  %394 = vmatpush.bf16.msrb.mxu1 %v559_v21  ;;  %v212_v17 = vperm.slane %v209_v12, 1 }
  0x2c   :  { %409 = vmatpush.bf16.msrb.mxu2 %v491_v35  ;;  %423 = vmatpush.bf16.msrb.mxu3 %v555_v38 }
  0x2f   :  { %381 = vmatpush.bf16.msrb.mxu0 %v487_v30  ;;  %395 = vmatpush.bf16.msrb.mxu1 %v551_v34 }
  0x30   :  { %410 = vmatpush.bf16.msrb.mxu2 %v483_v47  ;;  %424 = vmatpush.bf16.msrb.mxu3 %v547_v50 }
  0x33   :  { %382 = vmatpush.bf16.msrb.mxu0 %v479_v42  ;;  %396 = vmatpush.bf16.msrb.mxu1 %v543_v46 }
  0x93   :  { %v100_v51 = vpop.f32.mrf.mxu0  ;;  %v114_v52 = vpop.f32.mrf.mxu1 }
  0x94   :  { %v142_v53 = vpop.f32.mrf.mxu2 }
  0x95   :  { %v156_v55 = vpop.f32.mrf.mxu3  ;;  %v143_v56 = vadd.f32 %v142_v53, %v100_v51 }
  0x96   :  { %v157_v58 = vadd.f32 %v156_v55, %v114_v52 }
  0x97   :  { %v167_v62 = vadd.f32 %v163_v57, %v143_v56 }
  0x98   :  { %v168_v2 = vadd.f32 %v164_v59, %v157_v58 }
  0x99   :  { %v171_v5 = vmax.f32 %v167_v62, 0.0 }
  0x9a   :  { %v172_v8 = vmax.f32 %v168_v2, 0.0 }
  0x9b   :  { %v102_v60 = vpop.f32.mrf.mxu0  ;;  %v116_v0 = vpop.f32.mrf.mxu1 }
  0x9c   :  { %v144_v61 = vpop.f32.mrf.mxu2 }
  0x9d   :  { %v145_v63 = vadd.f32 %v144_v61, %v102_v60  ;;  %v158_v1 = vpop.f32.mrf.mxu3 }
  0x9e   :  { %v159_v4 = vadd.f32 %v158_v1, %v116_v0 }
  0x9f   :  { %v169_v3 = vadd.f32 %v163_v57, %v145_v63 }
  0xa0   :  { %v170_v7 = vadd.f32 %v164_v59, %v159_v4 }
  0xa1   :  { %v173_v6 = vmax.f32 %v169_v3, 0.0 }
  0xa2   :  { %v174_v9 = vmax.f32 %v170_v7, 0.0 }
  0xa3   :  { %v175_v10 = vpack.c.bf16 %v173_v6, %v171_v5 }
  0xa4   :  { %v176_v11 = vpack.c.bf16 %v174_v9, %v172_v8 }
  0xa5   :  { %383 = vmatmul.bf16.vlgmr.msrb.gmra.mxu0 %v175_v10  ;;  %411 = vmatmul.bf16.vlgmr.msrb.gmra.mxu2 %v175_v10 }
  0xa6   :  { %397 = vmatmul.bf16.vlgmr.msrb.gmra.mxu1 %v176_v11  ;;  %425 = vmatmul.bf16.vlgmr.msrb.gmra.mxu3 %v176_v11 }
 0x122   :  { %v384_v14 = vpop.f32.mrf.mxu0 }
 0x123   :  { %v385_v15 = vadd.f32 %v384_v14, %v211_v13  ;;  %v398_v16 = vpop.f32.mrf.mxu1 }
 0x125   :  { %v399_v18 = vadd.f32 %v398_v16, %v385_v15 }
 0x127   :  { %v431_v25 = vmax.f32 %v399_v18, 0.0 }
 0x128   :  { %v412_v20 = vpop.f32.mrf.mxu2 }
 0x129   :  { %v413_v21 = vadd.f32 %v412_v20, %v212_v17  ;;  %v426_v22 = vpop.f32.mrf.mxu3  ;;  %v441_v32 = vmul.f32 %v437_v24, %v431_v25 }
 0x12a   :  { %v386_v23 = vpop.f32.mrf.mxu0 }
 0x12b   :  { %v427_v26 = vadd.f32 %v426_v22, %v413_v21  ;;  %v387_v27 = vadd.f32 %v386_v23, %v211_v13  ;;  %v400_v30 = vpop.f32.mrf.mxu1 }
 0x12d   :  { %v432_v29 = vmax.f32 %v427_v26, 0.0  ;;  %v401_v31 = vadd.f32 %v400_v30, %v387_v27 }
 0x12f   :  { %v442_v33 = vmul.f32 %v438_v28, %v432_v29  ;;  %v433_v38 = vmax.f32 %v401_v31, 0.0 }
 0x130   :  { %v414_v34 = vpop.f32.mrf.mxu2 }
 0x131   :  { %v415_v35 = vadd.f32 %v414_v34, %v212_v17  ;;  %v445_v36 = vadd.f32 %v442_v33, %v441_v32  ;;  %v428_v37 = vpop.f32.mrf.mxu3  ;;  %v443_v41 = vmul.f32 %v437_v24, %v433_v38 }
 0x133   :  { %v429_v39 = vadd.f32 %v428_v37, %v415_v35  ;;  %446 = vadd.xlane.f32.xlu0 %v445_v36 }
 0x135   :  { %v434_v40 = vmax.f32 %v429_v39, 0.0 }
 0x137   :  { %v444_v42 = vmul.f32 %v438_v28, %v434_v40 }
 0x139   :  { %v448_v43 = vadd.f32 %v444_v42, %v443_v41 }
 0x13b   :  { %449 = vadd.xlane.f32.xlu0 %v448_v43 }
 0x1a6   :  { %v447_v45 = vpop.xlane.xlu0 %446 }
 0x1a7   :  { %v453_v46 = vadd.f32 %v452_v44, %v447_v45 }
 0x1a9   :  { %456 = vst.msk [vmem:[%s802_s9] sm:$0xff] %vm455_vm3, %v453_v46 }
 0x1ae   :  { %v450_v47 = vpop.xlane.xlu0 %449 }
 0x1af   :  { %v454_v48 = vadd.f32 %v452_v44, %v450_v47 }
 0x1b1   :  { %457 = vst.msk [vmem:[%s802_s9 + $0x8] sm:$0xff] %vm455_vm3, %v454_v48 }
 0x1b2   :  { %462 = vsyncpa [#allocation4], 1 }
 0x1b3   :  { %463 = vsyncpa [#allocation6], 1 }

</bundles_post_ra>
